<compile_context>
chip_gen: v7x
topology: tpu7x:2x2x1
jax: 0.10.0
libtpu: 0.0.40
codegen_flags: <defaults>
</compile_context>

<pallas_src>
import functools

import jax
import jax.numpy as jnp
from jax import lax
from jax.experimental import pallas as pl
from jax.experimental.pallas import tpu as pltpu

n_embd = 384
block_size = 256   # upper bound on T (size of the torch tril buffer)
_Q_TILE = 128      # query-tile size: keeps (tq, T) score tiles inside vreg budget


def _head_kernel(x_ref, wqkv_ref, o_ref, *, scale):
    # x_ref : (Bb, T, C) f32   -- one slab of Bb batches
    # wqkv  : (C, 3H)    bf16  -- fused [q | k | v] projection weights
    # o_ref : (Bb, T, H) f32
    Bb, T, C = x_ref.shape
    H = wqkv_ref.shape[1] // 3
    w = wqkv_ref[...]                                     # bf16, resident in VMEM

    num_q_tiles = pl.cdiv(T, _Q_TILE)                     # static python int

    for b in range(Bb):                                   # static unroll, Bb <= 8
        xb = x_ref[b].astype(jnp.bfloat16)                # (T, C)

        # One fused N=3H matmul instead of three N=H matmuls (full MXU width).
        qkv = jnp.dot(xb, w, preferred_element_type=jnp.float32)      # (T, 3H) f32

        # Apply softmax scale to q (T*H elements) instead of the (T, T) scores.
        q = (qkv[:, 0:H] * scale).astype(jnp.bfloat16)
        k = qkv[:, H:2 * H].astype(jnp.bfloat16)
        v = qkv[:, 2 * H:3 * H].astype(jnp.bfloat16)

        for qi in range(num_q_tiles):                     # static unroll (<= 2 at T=256)
            q0 = qi * _Q_TILE
            qs = min(_Q_TILE, T - q0)
            kv_len = q0 + qs                              # causal frontier: skip masked cols
            qb = q[q0:q0 + qs, :]                         # (qs, H)
            kb = k[:kv_len, :]                            # (kv_len, H)
            vb = v[:kv_len, :]

            # Contract head dim of q against head dim of k (no explicit .T).
            s = lax.dot_general(qb, kb, (((1,), (1,)), ((), ())),
                                preferred_element_type=jnp.float32)   # (qs, kv_len)

            # causal (tril) mask within the tile
            row = lax.broadcasted_iota(jnp.int32, (qs, kv_len), 0) + q0
            col = lax.broadcasted_iota(jnp.int32, (qs, kv_len), 1)
            s = jnp.where(col <= row, s, -jnp.inf)

            # numerically stable softmax along the key axis
            m = jnp.max(s, axis=-1, keepdims=True)
            e = jnp.exp(s - m)
            denom = jnp.sum(e, axis=-1, keepdims=True)
            p = (e * pl.reciprocal(denom, approx=True)).astype(jnp.bfloat16)

            # dropout on p: identity (eval mode)
            out = jnp.dot(p, vb, preferred_element_type=jnp.float32)  # (qs, H)
            o_ref[b, q0:q0 + qs, :] = out.astype(o_ref.dtype)


def _pick_batch_block(B):
    # Bb batches per grid step: amortize per-step pipeline overhead, but keep
    # >= 2 parallel grid points when possible (v7x has 2 TensorCores / chip).
    for bb in (8, 4, 2, 1):
        if B % bb == 0 and B // bb >= 2:
            return bb
    for bb in (8, 4, 2, 1):
        if B % bb == 0:
            return bb
    return 1


def head_forward(x, w_key, w_query, w_value):
    """x: (B, T, C) float32; w_*: (head_size, n_embd) torch-style Linear weights."""
    B, T, C = x.shape
    H = w_key.shape[0]
    assert C == n_embd and T <= block_size

    # Fuse the three projections: (C, 3H) = [q | k | v]; bf16 operands for the MXU.
    wqkv = jnp.concatenate([w_query.T, w_key.T, w_value.T], axis=1).astype(jnp.bfloat16)

    Bb = _pick_batch_block(B)
    scale = float(C) ** (-0.5)          # matches the torch code: C**-0.5 (n_embd), not H**-0.5
    kernel = functools.partial(_head_kernel, scale=scale)

    # TODO(synk): H=64 < 128 lanes -> masked output stores; fusing several heads
    # into one kernel (multi-head) would make the output last dim lane-dense.
    return pl.pallas_call(
        kernel,
        out_shape=jax.ShapeDtypeStruct((B, T, H), x.dtype),
        grid_spec=pltpu.PrefetchScalarGridSpec(
            num_scalar_prefetch=0,
            grid=(B // Bb,),
            in_specs=[
                pl.BlockSpec((Bb, T, C), lambda i: (i, 0, 0)),
                pl.BlockSpec((C, 3 * H), lambda i: (0, 0)),
            ],
            out_specs=pl.BlockSpec((Bb, T, H), lambda i: (i, 0, 0)),
        ),
        compiler_params=pltpu.CompilerParams(
            dimension_semantics=("parallel",)),
    )(x, wqkv)


def head_reference(x, w_key, w_query, w_value):
    """Pure-JAX f32 reference mirroring the torch forward (eval-mode dropout)."""
    B, T, C = x.shape
    k = x @ w_key.T
    q = x @ w_query.T
    v = x @ w_value.T
    wei = (q @ jnp.swapaxes(k, -2, -1)) * (float(C) ** -0.5)
    mask = jnp.tril(jnp.ones((T, T), dtype=bool))
    wei = jnp.where(mask, wei, -jnp.inf)
    wei = jax.nn.softmax(wei, axis=-1)
    return wei @ v


if __name__ == "__main__":
    key = jax.random.PRNGKey(0)
    B, T, head_size = 2, 8, 64

    k_x, k_wk, k_wq, k_wv = jax.random.split(key, 4)
    x = jax.random.normal(k_x, (B, T, n_embd), dtype=jnp.float32)
    # deterministic parameter init (torch Linear: weight shape (out, in))
    bound = 1.0 / (n_embd ** 0.5)
    w_key_p = jax.random.uniform(k_wk, (head_size, n_embd), jnp.float32, -bound, bound)
    w_query_p = jax.random.uniform(k_wq, (head_size, n_embd), jnp.float32, -bound, bound)
    w_value_p = jax.random.uniform(k_wv, (head_size, n_embd), jnp.float32, -bound, bound)

    out = head_forward(x, w_key_p, w_query_p, w_value_p)
    out = jax.block_until_ready(out)

    ref = head_reference(x, w_key_p, w_query_p, w_value_p)
    assert out.shape == (B, T, head_size)
    assert bool(jnp.all(jnp.isfinite(out))), "non-finite values in kernel output"
    # bf16 MXU operands (f32 accumulation) -> compare against the f32 reference
    # with a tolerance appropriate for bf16 input rounding.
    assert jnp.allclose(out, ref, atol=5e-2, rtol=5e-2), "mismatch vs reference"

    print("KERNEL_OK")
</pallas_src>

<mosaic_0001>
module attributes {stable_mosaic.version = 11 : i64} {
  func.func @_head_kernel(%arg0: i32, %arg1: memref<1x8x384xf32, #tpu.memory_space<vmem>>, %arg2: memref<384x192xbf16, #tpu.memory_space<vmem>>, %arg3: memref<1x8x64xf32, #tpu.memory_space<vmem>>) attributes {dimension_semantics = [#tpu.dimension_semantics<parallel>], iteration_bounds = array<i64: 2>, scalar_prefetch = 0 : i64, scratch_operands = 0 : i64, tpu.core_type = #tpu.core_type<tc>, window_params = [{transform_indices = @transform_0, window_bounds = array<i64: 1, 8, 384>}, {pipeline_mode = #tpu.pipeline_mode<synchronous>, transform_indices = @transform_1, window_bounds = array<i64: 384, 192>}, {transform_indices = @transform_2, window_bounds = array<i64: 1, 8, 64>}]} {
    %c0 = arith.constant 0 : index
    %c0_0 = arith.constant 0 : index
    %0 = vector.load %arg2[%c0, %c0_0] : memref<384x192xbf16, #tpu.memory_space<vmem>>, vector<384x192xbf16>
    %c0_1 = arith.constant 0 : index
    %c0_2 = arith.constant 0 : index
    %c0_3 = arith.constant 0 : index
    %1 = vector.load %arg1[%c0_1, %c0_2, %c0_3] : memref<1x8x384xf32, #tpu.memory_space<vmem>>, vector<1x8x384xf32>
    %2 = vector.shape_cast %1 : vector<1x8x384xf32> to vector<8x384xf32>
    %3 = arith.truncf %2 : vector<8x384xf32> to vector<8x384xbf16>
    %cst = arith.constant dense<0.000000e+00> : vector<8x192xf32>
    %4 = tpu.matmul %3, %0, %cst {dimension_numbers = #tpu.dot_dimension_numbers<[1], [0], [0], [1], [0, 0, 1, 1], [], []>} : vector<8x384xbf16>, vector<384x192xbf16>, vector<8x192xf32> -> vector<8x192xf32>
    %5 = vector.extract_strided_slice %4 {offsets = [0, 0], sizes = [8, 64], strides = [1, 1]} : vector<8x192xf32> to vector<8x64xf32>
    %cst_4 = arith.constant 0.0510310382 : f32
    %6 = vector.broadcast %cst_4 : f32 to vector<8x64xf32>
    %7 = arith.mulf %5, %6 : vector<8x64xf32>
    %8 = arith.truncf %7 : vector<8x64xf32> to vector<8x64xbf16>
    %9 = vector.extract_strided_slice %4 {offsets = [0, 64], sizes = [8, 64], strides = [1, 1]} : vector<8x192xf32> to vector<8x64xf32>
    %10 = arith.truncf %9 : vector<8x64xf32> to vector<8x64xbf16>
    %11 = vector.extract_strided_slice %4 {offsets = [0, 128], sizes = [8, 64], strides = [1, 1]} : vector<8x192xf32> to vector<8x64xf32>
    %12 = arith.truncf %11 : vector<8x64xf32> to vector<8x64xbf16>
    %cst_5 = arith.constant dense<0.000000e+00> : vector<8x8xf32>
    %13 = tpu.matmul %8, %10, %cst_5 {dimension_numbers = #tpu.dot_dimension_numbers<[1], [1], [0], [0], [0, 0, 1, 0], [], []>} : vector<8x64xbf16>, vector<8x64xbf16>, vector<8x8xf32> -> vector<8x8xf32>
    %14 = tpu.iota {dimensions = array<i32: 0>} : vector<8x8xi32>
    %c0_i32 = arith.constant 0 : i32
    %15 = vector.broadcast %c0_i32 : i32 to vector<8x8xi32>
    %16 = arith.addi %14, %15 : vector<8x8xi32>
    %17 = tpu.iota {dimensions = array<i32: 1>} : vector<8x8xi32>
    %18 = arith.cmpi sle, %17, %16 : vector<8x8xi32>
    %cst_6 = arith.constant 0xFF800000 : f32
    %19 = vector.broadcast %cst_6 : f32 to vector<8x8xf32>
    %20 = arith.select %18, %13, %19 : vector<8x8xi1>, vector<8x8xf32>
    %cst_7 = arith.constant dense<0xFF800000> : vector<8xf32>
    %21 = vector.multi_reduction <maximumf>, %20, %cst_7 [1] : vector<8x8xf32> to vector<8xf32>
    %22 = vector.shape_cast %21 : vector<8xf32> to vector<8x1xf32>
    %23 = vector.broadcast %22 : vector<8x1xf32> to vector<8x8xf32>
    %24 = arith.subf %20, %23 : vector<8x8xf32>
    %25 = math.exp %24 : vector<8x8xf32>
    %cst_8 = arith.constant dense<0.000000e+00> : vector<8xf32>
    %26 = vector.multi_reduction <add>, %25, %cst_8 [1] : vector<8x8xf32> to vector<8xf32>
    %27 = vector.shape_cast %26 : vector<8xf32> to vector<8x1xf32>
    %28 = tpu.reciprocal %27 {approx = true} : vector<8x1xf32> -> vector<8x1xf32>
    %29 = vector.broadcast %28 : vector<8x1xf32> to vector<8x8xf32>
    %30 = arith.mulf %25, %29 : vector<8x8xf32>
    %31 = arith.truncf %30 : vector<8x8xf32> to vector<8x8xbf16>
    %cst_9 = arith.constant dense<0.000000e+00> : vector<8x64xf32>
    %32 = tpu.matmul %31, %12, %cst_9 {dimension_numbers = #tpu.dot_dimension_numbers<[1], [0], [0], [1], [0, 0, 1, 1], [], []>} : vector<8x8xbf16>, vector<8x64xbf16>, vector<8x64xf32> -> vector<8x64xf32>
    %c0_10 = arith.constant 0 : index
    %c0_11 = arith.constant 0 : index
    %c0_12 = arith.constant 0 : index
    %33 = vector.load %arg3[%c0_10, %c0_11, %c0_12] : memref<1x8x64xf32, #tpu.memory_space<vmem>>, vector<1x8x64xf32>
    %34 = vector.shape_cast %33 : vector<1x8x64xf32> to vector<8x64xf32>
    %35 = vector.shape_cast %32 : vector<8x64xf32> to vector<1x8x64xf32>
    tpu.vector_store %arg3[%c0_10, %c0_11, %c0_12], %35 {strides = array<i32>} : memref<1x8x64xf32, #tpu.memory_space<vmem>>, vector<1x8x64xf32>,
    return
  }
  func.func @transform_0(%arg0: i32) -> (i32, i32, i32) {
    %c0_i32 = arith.constant 0 : i32
    %c0_i32_0 = arith.constant 0 : i32
    %c0_i32_1 = arith.constant 0 : i32
    return %arg0, %c0_i32, %c0_i32_0 : i32, i32, i32
  }
  func.func @transform_1(%arg0: i32) -> (i32, i32) {
    %c0_i32 = arith.constant 0 : i32
    %c0_i32_0 = arith.constant 0 : i32
    %c0_i32_1 = arith.constant 0 : i32
    return %c0_i32, %c0_i32_0 : i32, i32
  }
  func.func @transform_2(%arg0: i32) -> (i32, i32, i32) {
    %c0_i32 = arith.constant 0 : i32
    %c0_i32_0 = arith.constant 0 : i32
    %c0_i32_1 = arith.constant 0 : i32
    return %arg0, %c0_i32, %c0_i32_0 : i32, i32, i32
  }
}

</mosaic_0001>

<bundles_post_ra>
// kernel: tpu_custom_call.1
= control target key start
LH: loop header
LB: loop body
LE: loop exit
PB: predicated region body
PF: predicated region fallthrough
CT: control target
= control target key end

     0   :  { %7 = vsyncpa [#allocation3], 0  ;;  %s1252_s0 = inlined_call_operand.vmem [shape: f32[2,8,384], index: 0, kind: input, shape index: {}]   ;;  %s1253_s1 = inlined_call_operand.vmem [shape: bf16[384,192], index: 1, kind: input, shape index: {}]   ;;  %s1254_s2 = inlined_call_operand.hbm [shape: f32[2,8,64], index: 2, kind: output, shape index: {}]  }
   0x1   :  { %9 = vsyncpa [#allocation3 + $0x1], 0  ;;  %s995_s9 = smov 0   ;;  %s997_s10 = smov 0  }
   0x2   :  { %s999_s11 = smov 0   ;;  %s1001_s12 = smov 0  }
   0x3 LB: > { %s1016_s13 = sadd.s32 4294967295, %s973_s12   ;;  %s713_s14 = sadd.s32 4294967294, %s973_s12   ;;  %s973_s12 = sphi %s1001_s12, %s1260_s12   ;;  %s969_s11 = sphi %s999_s11, %s1259_s11   ;;  %s965_s10 = sphi %s997_s10, %s1258_s10   ;;  %s961_s9 = sphi %s995_s9, %s1257_s9  }
   0x4   : > { %s1020_s15 = sadd.s32 1, %s973_s12   ;;  %s69_s16 = sadd.s32 1, %s969_s11 }
   0x5   : > { %s66_s17 = ssub.s32 %s973_s12, %s1020_s15  ;;  %p79_p0 = scmp.ne.s32.totalorder %s969_s11, %s965_s10 }
   0x6   : > { %p67_p1 = scmp.eq.s32.totalorder %s66_s17, 0  ;;  %p80_p2 = scmp.eq.s32.totalorder %s1016_s13, 1 }
   0x7   : > { %p85_p3 = scmp.ne.s32.totalorder %s965_s10, %s961_s9  ;;  %p86_p4 = scmp.eq.s32.totalorder %s713_s14, 1 }
   0x8   : > { %s1031_s18 = scalar_select %p67_p1, %s969_s11, %s69_s16  }
   0x9   : > { %p1033_p5 = por %p80_p2, %p79_p0  ;;  %p1037_p6 = por %p86_p4, %p85_p3 }
   0xa   : > { %p716_p7 = scmp.ge.s32.totalorder %s973_s12, 1  ;;  %p115_p8 = scmp.lt.s32.totalorder %s973_s12, 3 }
   0xc   : > { %p116_p9 = pnand %p716_p7, %p115_p8 }
   0xd   : > { %v835_v0 = vld [vmem:[%s1253_s1 + $0x4] ss:$8 sps:$4 sm:$0xff] (!%p116_p9)   ;;  %v837_v1 = vld [vmem:[%s1253_s1] ss:$8 sps:$4 sm:$0xff] (!%p116_p9)   ;;  %v975_v2 = vmov (!%p116_p9), 0   ;;  %p137_p10 = scmp.lt.s32.totalorder (!%p116_p9), %s1016_s13, 1 }
   0xe   : > { %119 = sbr.rel (%p116_p9) target bundleno = 1173 (0x495), region = 28  ;;  %510 = vmatprep.mubr.bf16.mxu1 (!%p116_p9), %v975_v2  ;;  %437 = vmatprep.subr.bf16.mxu0 (!%p116_p9), %v835_v0  ;;  %v838_v3 = vld [vmem:[%s1253_s1 + $0x14] ss:$8 sps:$4 sm:$0xff] (!%p116_p9)   ;;  %v840_v4 = vld [vmem:[%s1253_s1 + $0x10] ss:$8 sps:$4 sm:$0xff] (!%p116_p9)   ;;  %v976_v59 = vmov (!%p116_p9), 0.0  }
   0xf   : > { %438 = vmatpush1.bf16.msra.mxu0 (!%p116_p9), %v837_v1  ;;  %v841_v5 = vld [vmem:[%s1253_s1 + $0x24] ss:$8 sps:$4 sm:$0xff] (!%p116_p9)   ;;  %v843_v6 = vld [vmem:[%s1253_s1 + $0x20] ss:$8 sps:$4 sm:$0xff] (!%p116_p9)   ;;  %v844_v7 = vld [vmem:[%s1253_s1 + $0x34] ss:$8 sps:$4 sm:$0xff] (!%p116_p9)  }
  0x10   : > { %439 = vmatprep.subr.bf16.mxu0 (!%p116_p9), %v838_v3  ;;  %v846_v8 = vld [vmem:[%s1253_s1 + $0x30] ss:$8 sps:$4 sm:$0xff] (!%p116_p9)   ;;  %v859_v9 = vld [vmem:[%s1253_s1 + $0x104] ss:$8 sps:$4 sm:$0xff] (!%p116_p9)   ;;  %v861_v10 = vld [vmem:[%s1253_s1 + $0x100] ss:$8 sps:$4 sm:$0xff] (!%p116_p9)  }
  0x11   : > { %v847_v11 = vld [vmem:[%s1253_s1 + $0x44] ss:$8 sps:$4 sm:$0xff] (!%p116_p9)   ;;  %478 = vmatprep.subr.bf16.mxu1 (!%p116_p9), %v859_v9  ;;  %v865_v12 = vld [vmem:[%s1253_s1 + $0x114] ss:$8 sps:$4 sm:$0xff] (!%p116_p9)   ;;  %v867_v13 = vld [vmem:[%s1253_s1 + $0x110] ss:$8 sps:$4 sm:$0xff] (!%p116_p9)   ;;  %v573_v9 = vlaneseq (!%p116_p9) }
  0x12   : > { %479 = vmatpush1.bf16.msra.mxu1 (!%p116_p9), %v861_v10  ;;  %v849_v14 = vld [vmem:[%s1253_s1 + $0x40] ss:$8 sps:$4 sm:$0xff] (!%p116_p9)   ;;  %v850_v15 = vld [vmem:[%s1253_s1 + $0x54] ss:$8 sps:$4 sm:$0xff] (!%p116_p9)   ;;  %v871_v16 = vld [vmem:[%s1253_s1 + $0x124] ss:$8 sps:$4 sm:$0xff] (!%p116_p9)  }
  0x13   : > { %440 = vmatpush1.bf16.msra.mxu0 (!%p116_p9), %v840_v4  ;;  %480 = vmatprep.subr.bf16.mxu1 (!%p116_p9), %v865_v12  ;;  %v873_v17 = vld [vmem:[%s1253_s1 + $0x120] ss:$8 sps:$4 sm:$0xff] (!%p116_p9)   ;;  %v852_v18 = vld [vmem:[%s1253_s1 + $0x50] ss:$8 sps:$4 sm:$0xff] (!%p116_p9)   ;;  %v877_v19 = vld [vmem:[%s1253_s1 + $0x134] ss:$8 sps:$4 sm:$0xff] (!%p116_p9)  }
  0x14   : > { %441 = vmatprep.subr.bf16.mxu0 (!%p116_p9), %v841_v5  ;;  %v853_v20 = vld [vmem:[%s1253_s1 + $0x64] ss:$8 sps:$4 sm:$0xff] (!%p116_p9)   ;;  %v879_v21 = vld [vmem:[%s1253_s1 + $0x130] ss:$8 sps:$4 sm:$0xff] (!%p116_p9)   ;;  %v855_v22 = vld [vmem:[%s1253_s1 + $0x60] ss:$8 sps:$4 sm:$0xff] (!%p116_p9)  }
  0x15   : > { %v883_v23 = vld [vmem:[%s1253_s1 + $0x144] ss:$8 sps:$4 sm:$0xff]   ;;  %s138_s29 = scalar_select %p137_p10, %s1016_s13, 1  ;;  %v856_v24 = vld [vmem:[%s1253_s1 + $0x74] ss:$8 sps:$4 sm:$0xff]   ;;  %vm977_vm0 = vmmov 0  }
  0x16   : > { %481 = vmatpush1.bf16.msra.mxu1 %v867_v13  ;;  %v885_v25 = vld [vmem:[%s1253_s1 + $0x140] ss:$8 sps:$4 sm:$0xff]   ;;  %v858_v26 = vld [vmem:[%s1253_s1 + $0x70] ss:$8 sps:$4 sm:$0xff]   ;;  %v889_v27 = vld [vmem:[%s1253_s1 + $0x154] ss:$8 sps:$4 sm:$0xff]  }
  0x17   : > { %442 = vmatpush1.bf16.msra.mxu0 %v843_v6  ;;  %482 = vmatprep.subr.bf16.mxu1 %v871_v16  ;;  %s791_s16 = smul.u32 24, %s138_s29  ;;  %v862_v28 = vld [vmem:[%s1253_s1 + $0x84] ss:$8 sps:$4 sm:$0xff]   ;;  %v891_v29 = vld [vmem:[%s1253_s1 + $0x150] ss:$8 sps:$4 sm:$0xff]   ;;  %vm526_vm1 = vcmask 523264  }
  0x18   : > { %443 = vmatprep.subr.bf16.mxu0 %v844_v7  ;;  %v864_v30 = vld [vmem:[%s1253_s1 + $0x80] ss:$8 sps:$4 sm:$0xff]   ;;  %v895_v31 = vld [vmem:[%s1253_s1 + $0x164] ss:$8 sps:$4 sm:$0xff]   ;;  %v868_v32 = vld [vmem:[%s1253_s1 + $0x94] ss:$8 sps:$4 sm:$0xff]  }
  0x19   : > { %s1141_s30 = scalar_lea.vmem %s1252_s0, %s791_s16  ;;  %v897_v35 = vld [vmem:[%s1253_s1 + $0x160] ss:$8 sps:$4 sm:$0xff]   ;;  %v870_v36 = vld [vmem:[%s1253_s1 + $0x90] ss:$8 sps:$4 sm:$0xff]   ;;  %v901_v37 = vld [vmem:[%s1253_s1 + $0x174] ss:$8 sps:$4 sm:$0xff]  }
  0x1a   : > { %483 = vmatpush1.bf16.msra.mxu1 %v873_v17  ;;  %v192_v33 = vld [vmem:[%s1141_s30 + $0x8] sm:$0xff]  ;;  %v903_v39 = vld [vmem:[%s1253_s1 + $0x170] ss:$8 sps:$4 sm:$0xff]   ;;  %v880_v42 = vld [vmem:[%s1253_s1 + $0xb4] ss:$8 sps:$4 sm:$0xff]   ;;  %vm595_vm2 = vcmask 1043456  }
  0x1b   : > { %444 = vmatpush1.bf16.msra.mxu0 %v846_v8  ;;  %484 = vmatprep.subr.bf16.mxu1 %v877_v19  ;;  %v195_v34 = vpack.c.bf16 %v192_v33, %v192_v33  ;;  %v874_v38 = vld [vmem:[%s1253_s1 + $0xa4] ss:$8 sps:$4 sm:$0xff]   ;;  %v193_v40 = vld [vmem:[%s1141_s30 + $0x10] sm:$0xff]  ;;  %v876_v41 = vld [vmem:[%s1253_s1 + $0xa0] ss:$8 sps:$4 sm:$0xff]   ;;  %v574_v10 = vshrl.u32 %v573_v9, 7 }
  0x1c   : > { %445 = vmatprep.subr.bf16.mxu0 %v847_v11  ;;  %v196_v43 = vpack.c.bf16 %v193_v40, %v193_v40  ;;  %v882_v44 = vld [vmem:[%s1253_s1 + $0xb0] ss:$8 sps:$4 sm:$0xff]   ;;  %v886_v45 = vld [vmem:[%s1253_s1 + $0xc4] ss:$8 sps:$4 sm:$0xff]   ;;  %v888_v46 = vld [vmem:[%s1253_s1 + $0xc0] ss:$8 sps:$4 sm:$0xff]  }
  0x1d   : > { %469 = vmatprep.mubr.bf16.mxu0 %v195_v34  ;;  %v892_v47 = vld [vmem:[%s1253_s1 + $0xd4] ss:$8 sps:$4 sm:$0xff]   ;;  %v894_v48 = vld [vmem:[%s1253_s1 + $0xd0] ss:$8 sps:$4 sm:$0xff]   ;;  %v898_v49 = vld [vmem:[%s1253_s1 + $0xe4] ss:$8 sps:$4 sm:$0xff]  }
  0x1e   : > { %485 = vmatpush1.bf16.msra.mxu1 %v879_v21  ;;  %v900_v50 = vld [vmem:[%s1253_s1 + $0xe0] ss:$8 sps:$4 sm:$0xff]   ;;  %v904_v51 = vld [vmem:[%s1253_s1 + $0xf4] ss:$8 sps:$4 sm:$0xff]   ;;  %v906_v52 = vld [vmem:[%s1253_s1 + $0xf0] ss:$8 sps:$4 sm:$0xff]  }
  0x1f   : > { %446 = vmatpush1.bf16.msra.mxu0 %v849_v14  ;;  %486 = vmatprep.subr.bf16.mxu1 %v883_v23  ;;  %v191_v53 = vld [vmem:[%s1141_s30] sm:$0xff]  ;;  %s978_s30 = smov 64   ;;  %v576_v11 = vand.u32 127, %v573_v9  ;;  %vm579_vm4 = vcmask 64512   ;;  %s134_s28 = sand.u32 1, %s965_s10  }
  0x20   : > { %447 = vmatprep.subr.bf16.mxu0 %v850_v15  ;;  %v194_v54 = vpack.c.bf16 %v191_v53, %v191_v53  ;;  %s717_s29 = sshll.u32 %s134_s28, 3  ;;  %s770_s3 = sshll.u32 %s1016_s13, 7 }
  0x21   : > { %vm577_vm3 = vcmp.le.s32.totalorder %v576_v11, %v574_v10  ;;  %s136_s4 = scalar_lea.vmem [#allocation2], %s717_s29  ;;  %s1209_s8 = scalar_lea.hbm %s1254_s2, %s770_s3 }
  0x22   : > { %487 = vmatpush1.bf16.msra.mxu1 %v885_v25  ;;  %s654_s5 = sshll.u32 %s136_s4, 4  ;;  %s641_s14 = scalar_lea.sflag [#allocation3], %s134_s28  ;;  %s1211_s5 = int_to_ptr.vmem [resolvable:$true] %s654_s5 }
  0x23   : > { %448 = vmatpush1.bf16.msra.mxu0 %v852_v18  ;;  %488 = vmatprep.subr.bf16.mxu1 %v889_v27  ;;  %s911_s16 = scalar_lea.vmem %s1211_s5, 128  ;;  %s979_s13 = smov [#allocation2]  }
  0x24   : > { %449 = vmatprep.subr.bf16.mxu0 %v853_v20  ;;  %p912_p11 = scmp.ne.s32.totalorder %s1211_s5, %s911_s16  ;;  %s915_s17 = sshll.u32 %s979_s13, 4  ;;  %s916_s17 = int_to_ptr.vmem [resolvable:$false] %s915_s17 }
  0x25   : > { %s917_s21 = scalar_lea.vmem %s916_s17, 256  ;;  %p918_p0 = scmp.lt.s32.totalorder %s1211_s5, %s916_s17 }
  0x26   : > { %489 = vmatpush1.bf16.msra.mxu1 %v891_v29  ;;  %p913_p12 = pnand %p912_p11, %p1033_p5  ;;  %p919_p1 = scmp.lt.s32.totalorder %s917_s21, %s911_s16 }
  0x27   : > { %450 = vmatpush1.bf16.msra.mxu0 %v855_v22  ;;  %490 = vmatprep.subr.bf16.mxu1 %v895_v31 }
  0x28   : > { %451 = vmatprep.subr.bf16.mxu0 %v856_v24  ;;  %p914_p13 = pneg %p913_p12  ;;  %p920_p2 = por %p919_p1, %p918_p0 }
  0x2a   : > { %491 = vmatpush1.bf16.msra.mxu1 %v897_v35  ;;  %p921_p3 = pnand %p920_p2, %p914_p13 }
  0x2b   : > { %452 = vmatpush1.bf16.msra.mxu0 %v858_v26  ;;  %492 = vmatprep.subr.bf16.mxu1 %v901_v37 }
  0x2c   : > { %453 = vmatprep.subr.bf16.mxu0 %v862_v28 }
  0x2e   : > { %493 = vmatpush1.bf16.msra.mxu1 %v903_v39 }
  0x2f   : > { %454 = vmatpush1.bf16.msra.mxu0 %v864_v30  ;;  %777 = vmatprep.subr.bf16.mxu1 %v976_v59 }
  0x30   : > { %455 = vmatprep.subr.bf16.mxu0 %v868_v32 }
  0x31   : > { %511 = vmatmul.mubr.bf16.vlgmr.msra.gmra.mrb[0].mxu1 %v196_v43 }
  0x32   : > { %779 = vmatprep.mubr.msk.bf16.mxu1 %vm977_vm0, %v976_v59 }
  0x33   : > { %456 = vmatpush1.bf16.msra.mxu0 %v870_v36 }
  0x34   : > { %457 = vmatprep.subr.bf16.mxu0 %v874_v38 }
  0x37   : > { %458 = vmatpush1.bf16.msra.mxu0 %v876_v41 }
  0x38   : > { %459 = vmatprep.subr.bf16.mxu0 %v880_v42 }
  0x3b   : > { %460 = vmatpush1.bf16.msra.mxu0 %v882_v44 }
  0x3c   : > { %461 = vmatprep.subr.bf16.mxu0 %v886_v45 }
  0x3f   : > { %462 = vmatpush1.bf16.msra.mxu0 %v888_v46 }
  0x40   : > { %463 = vmatprep.subr.bf16.mxu0 %v892_v47 }
  0x43   : > { %464 = vmatpush1.bf16.msra.mxu0 %v894_v48 }
  0x44   : > { %465 = vmatprep.subr.bf16.mxu0 %v898_v49 }
  0x47   : > { %466 = vmatpush1.bf16.msra.mxu0 %v900_v50 }
  0x48   : > { %467 = vmatprep.subr.bf16.mxu0 %v904_v51 }
  0x4b   : > { %468 = vmatpush1.bf16.msra.mxu0 %v906_v52 }
  0x4e   : > { %470 = vmatmul.mubr.bf16.vlgmr.msra.gmra.mrb[0].mxu0 %v194_v54 }
 0x104   : > { %v512_v55 = vpop.f32.mrb[0].mxu1 }
 0x105   : > { %v514_v56 = vpop.f32.mrb[1].mxu1 }
 0x106   : > { %v516_v57 = vpop.f32.mrb[2].mxu1 }
 0x107   : > { %v517_v58 = vpop.f32.mrb[3].mxu1 }
 0x121   : > { %v471_v60 = vpop.f32.mrb[0].mxu0 }
 0x122   : > { %v513_v61 = vadd.f32 %v512_v55, %v471_v60  ;;  %v473_v62 = vpop.f32.mrb[1].mxu0 }
 0x123   : > { %v515_v63 = vadd.f32 %v514_v56, %v473_v62  ;;  %v475_v0 = vpop.f32.mrb[2].mxu0 }
 0x124   : > { %v476_v1 = vpop.f32.mrb[3].mxu0  ;;  %v521_v2 = vpack.c.bf16 %v513_v61, %v513_v61  ;;  %v519_v5 = vmul.f32 0.05103104, %v513_v61 }
 0x125   : > { %v522_v6 = vpack.c.bf16 %v515_v63, %v515_v63 }
 0x126   : > { %524 = vrot.lane.b32.xlu0 %v521_v2, %s978_s30  ;;  %v520_v7 = vpack.c.bf16 %v519_v5, %v519_v5 }
 0x127   : > { %v597_v8 = vsel %vm595_vm2, %v522_v6, 0 }
 0x198   : > { %v525_v3 = vpop.permute.xlu0 %524 }
 0x199   : > { %v531_v4 = vsel %vm526_vm1, %v525_v3, 0 }
 0x19a   : > { %778 = vmatpush3.bf16.xpose.msra.mxu1 %v531_v4 }
 0x19b   : > { %783 = vmatprep.subr.bf16.mxu1 %v976_v59 }
 0x1a1   : > { %780 = vmatmul.mubr.msk.bf16.vlgmr.msra.gmra.mrb[4].mxu1 %vm526_vm1, %v520_v7 }
 0x1a2   : > { %784 = vmatpush3.bf16.msra.mxu1 %v597_v8  ;;  %785 = vmatprep.mubr.msk.bf16.mxu1 %vm977_vm0, %v976_v59 }
 0x274   : > { %v567_v12 = vpop.f32.mrb[4].mxu1 }
 0x275   : > { %v578_v13 = vsel %vm577_vm3, %v567_v12, -inf  ;;  %v781_v14 = vpop.f32.mrb[5].mxu1 }
 0x276   : > { %v570_v15 = vpop.f32.mrb[6].mxu1  ;;  %v580_v16 = vsel %vm579_vm4, %v578_v13, -inf }
 0x277   : > { %581 = vmax.xlane.f32.xlu0 %v580_v16  ;;  %v782_v17 = vpop.f32.mrb[7].mxu1 }
 0x304   : > { %v582_v18 = vpop.xlane.xlu0 %581 }
 0x305   : > { %v583_v19 = vsub.f32 %v578_v13, %v582_v18 }
 0x307   : > { %v584_v20 = vmul.f32 1.442695, %v583_v19 }
 0x309   : > { %907 = vpow2.f32 %v584_v20 }
 0x313   : > { %v908_v21 = vpop.eup %907 }
 0x314   : > { %v586_v22 = vsel %vm579_vm4, %v908_v21, 0.0 }
 0x315   : > { %587 = vadd.xlane.f32.xlu1 %v586_v22 }
 0x3a2   : > { %v588_v23 = vpop.xlane.xlu1 %587 }
 0x3a3   : > { %909 = vrcp.f32 %v588_v23 }
 0x3ad   : > { %v910_v24 = vpop.eup %909 }
 0x3ae   : > { %v590_v25 = vmul.f32 %v910_v24, %v908_v21 }
 0x3b0   : > { %v591_v26 = vpack.c.bf16 %v590_v25, %v590_v25 }
 0x3b2   : > { %786 = vmatmul.mubr.msk.bf16.vlgmr.msra.gmra.mrb[8].mxu1 %vm579_vm4, %v591_v26 }
 0x485   : > { %v633_v27 = vpop.f32.mrb[8].mxu1 }
 0x486   : > { %639 = vst.msk [vmem:[%s136_s4] sm:$0xff] %vm526_vm1, %v633_v27  ;;  %v787_v28 = vpop.f32.mrb[9].mxu1 }
 0x487   : > { %v636_v29 = vpop.f32.mrb[10].mxu1 }
 0x488   : > { %924 = shalt.err (!%p921_p3)
}
 0x489   : > { %s925_s22 = scalar_lea.hbm %s1209_s8, 128  ;;  %s929_s25 = scalar_lea.hbm %s1254_s2, 256 }
 0x48a   : > { %p926_p4 = scmp.ne.s32.totalorder %s1209_s8, %s925_s22  ;;  %p930_p9 = scmp.lt.u32.totalorder %s1209_s8, %s1254_s2 }
 0x48b   : > { %p931_p10 = scmp.lt.u32.totalorder %s929_s25, %s925_s22  ;;  %p933_p12 = scmp.lt.u32.totalorder %s925_s22, %s1209_s8 }
 0x48c   : > { %p927_p7 = pnand %p926_p4, %p1033_p5 }
 0x48d   : > { %p932_p11 = por %p931_p10, %p930_p9 }
 0x48e   : > { %p928_p8 = pneg %p927_p7 }
 0x48f   : > { %p934_p13 = por %p933_p12, %p932_p11 }
 0x491   : > { %p935_p0 = pnand %p934_p13, %p928_p8 }
 0x493   : > { %938 = shalt.err (!%p935_p0)
}
 0x494   : > { %792 = dma.vmem_to_hbm [thread:$0]  (%p1033_p5), %s1211_s5, 128, %s1209_s8, %s641_s14   ;;  %v788_v30 = vpop.f32.mrb[11].mxu1 }
 0x495 PF: > { %p798_p1 = scmp.ge.s32.totalorder %s973_s12, 2  ;;  %s666_s30 = sand.u32 1, %s961_s9  }
 0x496   : > { %s667_s28 = scalar_lea.sflag [#allocation3], %s666_s30 }
 0x497   : > { %p795_p2 = pnand %p798_p1, %p1037_p6 }
 0x499   : > { %956 = dma.done.wait (!%p795_p2), %s667_s28, 128  }
 0x49a   : > { %958 = vsyncadd (!%p795_p2), %s667_s28, 4294967168  ;;  %p12_p3 = scmp.ge.s32.totalorder %s1020_s15, 4   ;;  %s1257_s9 = smov %s965_s10 }
 0x49b   : > { %s1258_s10 = smov %s969_s11  ;;  %s1259_s11 = smov %s1031_s18 }
 0x49c   : > { %s1260_s12 = smov %s1020_s15  ;;  %14 = sbr.rel (!%p12_p3) target bundleno = 3 (0x3), region = 63 }
 0x4a3   :  { %672 = vsyncpa [#allocation3], 1 }
 0x4a4   :  { %674 = vsyncpa [#allocation3 + $0x1], 1 }

</bundles_post_ra>
